<compile_context>
chip_gen: v7x
topology: tpu7x:2x2x1
jax: 0.10.0
libtpu: 0.0.40
codegen_flags: <defaults>
</compile_context>

<pallas_src>
from functools import partial

import jax
import jax.numpy as jnp
from jax.experimental import pallas as pl
from jax.experimental.pallas import tpu as pltpu


def lstm_fc_kernel(x_ref, wih_ref, whh_ref, b_ref, wfc_ref, bfc_ref, out_ref, *, B, T):
    H = whh_ref.shape[0]

    # ---- hoisted input projection: one (T*B, I) @ (I, 4H) matmul for all timesteps ----
    gates_x = (jnp.dot(x_ref[...], wih_ref[...],
                       preferred_element_type=jnp.float32)
               + b_ref[...])                                   # (T*B, 4H), time-major

    whh = whh_ref[...]                                          # (H, 4H), loaded once

    h = jnp.zeros((B, H), dtype=jnp.float32)
    c = jnp.zeros((B, H), dtype=jnp.float32)
    hs = []                                                     # hidden states in vregs

    # ---- recurrence: fully unrolled (T small & static); only h @ W_hh^T per step ----
    for t in range(T):
        gates = gates_x[t * B:(t + 1) * B, :] + jnp.dot(
            h, whh, preferred_element_type=jnp.float32)         # (B, 4H)

        # one full-vreg sigmoid pass; i/f/o are lane slices of it
        s = jax.nn.sigmoid(gates)
        i_g = s[:, 0:H]
        f_g = s[:, H:2 * H]
        o_g = s[:, 3 * H:4 * H]
        g_g = jnp.tanh(gates[:, 2 * H:3 * H])

        c = f_g * c + i_g * g_g
        h = o_g * jnp.tanh(c)
        hs.append(h)

    # ---- FC head applied once over all timesteps, single lane-dense 2D writeback ----
    hs_all = jnp.concatenate(hs, axis=0)                        # (T*B, H), time-major
    out_ref[...] = (jnp.dot(hs_all, wfc_ref[...],
                            preferred_element_type=jnp.float32)
                    + bfc_ref[...])                             # (T*B, O)


def improved_rnn_forward(x, w_ih, w_hh, b_ih, b_hh, w_fc, b_fc):
    """x: (B, T, I) float32 (batch_first).  Weights in PyTorch layout:
       w_ih (4H, I), w_hh (4H, H), b_ih (4H,), b_hh (4H,), w_fc (O, H), b_fc (O,)."""
    B, T, I = x.shape
    H = w_hh.shape[1]
    O = w_fc.shape[0]

    # time-major, flattened staging (wrapper-side layout plumbing — free in XLA)
    x_tm = jnp.transpose(x, (1, 0, 2)).reshape(T * B, I).astype(jnp.float32)
    wih_t = jnp.transpose(w_ih).astype(jnp.float32)             # (I, 4H)
    whh_t = jnp.transpose(w_hh).astype(jnp.float32)             # (H, 4H)
    b_row = (b_ih + b_hh).reshape(1, 4 * H).astype(jnp.float32)
    wfc_t = jnp.transpose(w_fc).astype(jnp.float32)             # (H, O)
    bfc_row = b_fc.reshape(1, O).astype(jnp.float32)

    y = pl.pallas_call(
        partial(lstm_fc_kernel, B=B, T=T),
        out_shape=jax.ShapeDtypeStruct((T * B, O), jnp.float32),
        grid_spec=pltpu.PrefetchScalarGridSpec(
            num_scalar_prefetch=0,
            grid=(1,),                                           # single invocation
            in_specs=[
                pl.BlockSpec((T * B, I), lambda i: (0, 0)),      # x, time-major flat
                pl.BlockSpec((I, 4 * H), lambda i: (0, 0)),      # W_ih^T
                pl.BlockSpec((H, 4 * H), lambda i: (0, 0)),      # W_hh^T
                pl.BlockSpec((1, 4 * H), lambda i: (0, 0)),      # b_ih + b_hh
                pl.BlockSpec((H, O), lambda i: (0, 0)),          # W_fc^T
                pl.BlockSpec((1, O), lambda i: (0, 0)),          # b_fc
            ],
            out_specs=pl.BlockSpec((T * B, O), lambda i: (0, 0)),
        ),
        compiler_params=pltpu.CompilerParams(
            dimension_semantics=("arbitrary",)),
    )(x_tm, wih_t, whh_t, b_row, wfc_t, bfc_row)

    # (T*B, O) -> (B, T, O) in the wrapper (128 floats; negligible)
    return jnp.transpose(y.reshape(T, B, O), (1, 0, 2))


def reference_forward(x, w_ih, w_hh, b_ih, b_hh, w_fc, b_fc):
    """Pure-JAX reference matching torch.nn.LSTM + nn.Linear."""
    B, T, I = x.shape
    H = w_hh.shape[1]

    def step(carry, x_t):
        h, c = carry
        gates = x_t @ w_ih.T + b_ih + h @ w_hh.T + b_hh
        i, f, g, o = jnp.split(gates, 4, axis=-1)
        i = jax.nn.sigmoid(i)
        f = jax.nn.sigmoid(f)
        g = jnp.tanh(g)
        o = jax.nn.sigmoid(o)
        c = f * c + i * g
        h = o * jnp.tanh(c)
        return (h, c), h

    init = (jnp.zeros((B, H), jnp.float32), jnp.zeros((B, H), jnp.float32))
    _, hs = jax.lax.scan(step, init, jnp.transpose(x, (1, 0, 2)))
    hs = jnp.transpose(hs, (1, 0, 2))              # (B, T, H)
    return hs @ w_fc.T + b_fc


if __name__ == "__main__":
    # Small shapes consistent with the module's forward
    B, T = 2, 8
    input_size, hidden_size, output_size = 16, 32, 8

    key = jax.random.PRNGKey(0)
    keys = jax.random.split(key, 8)
    bound = 1.0 / jnp.sqrt(hidden_size)

    x = jax.random.normal(keys[0], (B, T, input_size), dtype=jnp.float32)
    w_ih = jax.random.uniform(keys[1], (4 * hidden_size, input_size),
                              minval=-bound, maxval=bound, dtype=jnp.float32)
    w_hh = jax.random.uniform(keys[2], (4 * hidden_size, hidden_size),
                              minval=-bound, maxval=bound, dtype=jnp.float32)
    b_ih = jax.random.uniform(keys[3], (4 * hidden_size,),
                              minval=-bound, maxval=bound, dtype=jnp.float32)
    b_hh = jax.random.uniform(keys[4], (4 * hidden_size,),
                              minval=-bound, maxval=bound, dtype=jnp.float32)
    w_fc = jax.random.uniform(keys[5], (output_size, hidden_size),
                              minval=-bound, maxval=bound, dtype=jnp.float32)
    b_fc = jax.random.uniform(keys[6], (output_size,),
                              minval=-bound, maxval=bound, dtype=jnp.float32)

    out = improved_rnn_forward(x, w_ih, w_hh, b_ih, b_hh, w_fc, b_fc)
    out = jax.block_until_ready(out)

    ref = reference_forward(x, w_ih, w_hh, b_ih, b_hh, w_fc, b_fc)
    ref = jax.block_until_ready(ref)

    assert out.shape == (B, T, output_size)
    assert jnp.allclose(out, ref, atol=1e-5, rtol=1e-5), "mismatch vs reference"

    print("KERNEL_OK")
</pallas_src>

<mosaic_0001>
module attributes {stable_mosaic.version = 11 : i64} {
  func.func @lstm_fc_kernel(%arg0: i32, %arg1: memref<16x16xf32, #tpu.memory_space<vmem>>, %arg2: memref<16x128xf32, #tpu.memory_space<vmem>>, %arg3: memref<32x128xf32, #tpu.memory_space<vmem>>, %arg4: memref<1x128xf32, #tpu.memory_space<vmem>>, %arg5: memref<32x8xf32, #tpu.memory_space<vmem>>, %arg6: memref<1x8xf32, #tpu.memory_space<vmem>>, %arg7: memref<16x8xf32, #tpu.memory_space<vmem>>) attributes {dimension_semantics = [#tpu.dimension_semantics<arbitrary>], iteration_bounds = array<i64: 1>, scalar_prefetch = 0 : i64, scratch_operands = 0 : i64, tpu.core_type = #tpu.core_type<tc>, window_params = [{pipeline_mode = #tpu.pipeline_mode<synchronous>, transform_indices = @transform_0, window_bounds = array<i64: 16, 16>}, {pipeline_mode = #tpu.pipeline_mode<synchronous>, transform_indices = @transform_1, window_bounds = array<i64: 16, 128>}, {pipeline_mode = #tpu.pipeline_mode<synchronous>, transform_indices = @transform_2, window_bounds = array<i64: 32, 128>}, {pipeline_mode = #tpu.pipeline_mode<synchronous>, transform_indices = @transform_3, window_bounds = array<i64: 1, 128>}, {pipeline_mode = #tpu.pipeline_mode<synchronous>, transform_indices = @transform_4, window_bounds = array<i64: 32, 8>}, {pipeline_mode = #tpu.pipeline_mode<synchronous>, transform_indices = @transform_5, window_bounds = array<i64: 1, 8>}, {pipeline_mode = #tpu.pipeline_mode<synchronous>, transform_indices = @transform_6, window_bounds = array<i64: 16, 8>}]} {
    %c0 = arith.constant 0 : index
    %c0_0 = arith.constant 0 : index
    %0 = vector.load %arg1[%c0, %c0_0] : memref<16x16xf32, #tpu.memory_space<vmem>>, vector<16x16xf32>
    %c0_1 = arith.constant 0 : index
    %c0_2 = arith.constant 0 : index
    %1 = vector.load %arg2[%c0_1, %c0_2] : memref<16x128xf32, #tpu.memory_space<vmem>>, vector<16x128xf32>
    %cst = arith.constant dense<0.000000e+00> : vector<16x128xf32>
    %2 = tpu.matmul %0, %1, %cst {dimension_numbers = #tpu.dot_dimension_numbers<[1], [0], [0], [1], [0, 0, 1, 1], [], []>} : vector<16x16xf32>, vector<16x128xf32>, vector<16x128xf32> -> vector<16x128xf32>
    %c0_3 = arith.constant 0 : index
    %c0_4 = arith.constant 0 : index
    %3 = vector.load %arg4[%c0_3, %c0_4] : memref<1x128xf32, #tpu.memory_space<vmem>>, vector<1x128xf32>
    %4 = vector.broadcast %3 : vector<1x128xf32> to vector<16x128xf32>
    %5 = arith.addf %2, %4 : vector<16x128xf32>
    %c0_5 = arith.constant 0 : index
    %c0_6 = arith.constant 0 : index
    %6 = vector.load %arg3[%c0_5, %c0_6] : memref<32x128xf32, #tpu.memory_space<vmem>>, vector<32x128xf32>
    %cst_7 = arith.constant 0.000000e+00 : f32
    %7 = vector.broadcast %cst_7 : f32 to vector<2x32xf32>
    %cst_8 = arith.constant 0.000000e+00 : f32
    %8 = vector.broadcast %cst_8 : f32 to vector<2x32xf32>
    %9 = vector.extract_strided_slice %5 {offsets = [0, 0], sizes = [2, 128], strides = [1, 1]} : vector<16x128xf32> to vector<2x128xf32>
    %cst_9 = arith.constant dense<0.000000e+00> : vector<2x128xf32>
    %10 = tpu.matmul %7, %6, %cst_9 {dimension_numbers = #tpu.dot_dimension_numbers<[1], [0], [0], [1], [0, 0, 1, 1], [], []>} : vector<2x32xf32>, vector<32x128xf32>, vector<2x128xf32> -> vector<2x128xf32>
    %11 = arith.addf %9, %10 : vector<2x128xf32>
    %12 = arith.negf %11 : vector<2x128xf32>
    %13 = math.exp %12 : vector<2x128xf32>
    %cst_10 = arith.constant 1.000000e+00 : f32
    %14 = vector.broadcast %cst_10 : f32 to vector<2x128xf32>
    %15 = arith.addf %14, %13 : vector<2x128xf32>
    %16 = arith.divf %14, %15 : vector<2x128xf32>
    %17 = vector.extract_strided_slice %16 {offsets = [0, 0], sizes = [2, 32], strides = [1, 1]} : vector<2x128xf32> to vector<2x32xf32>
    %18 = vector.extract_strided_slice %16 {offsets = [0, 32], sizes = [2, 32], strides = [1, 1]} : vector<2x128xf32> to vector<2x32xf32>
    %19 = vector.extract_strided_slice %16 {offsets = [0, 96], sizes = [2, 32], strides = [1, 1]} : vector<2x128xf32> to vector<2x32xf32>
    %20 = vector.extract_strided_slice %11 {offsets = [0, 64], sizes = [2, 32], strides = [1, 1]} : vector<2x128xf32> to vector<2x32xf32>
    %21 = math.tanh %20 : vector<2x32xf32>
    %22 = arith.mulf %18, %8 : vector<2x32xf32>
    %23 = arith.mulf %17, %21 : vector<2x32xf32>
    %24 = arith.addf %22, %23 : vector<2x32xf32>
    %25 = math.tanh %24 : vector<2x32xf32>
    %26 = arith.mulf %19, %25 : vector<2x32xf32>
    %27 = vector.extract_strided_slice %5 {offsets = [2, 0], sizes = [2, 128], strides = [1, 1]} : vector<16x128xf32> to vector<2x128xf32>
    %cst_11 = arith.constant dense<0.000000e+00> : vector<2x128xf32>
    %28 = tpu.matmul %26, %6, %cst_11 {dimension_numbers = #tpu.dot_dimension_numbers<[1], [0], [0], [1], [0, 0, 1, 1], [], []>} : vector<2x32xf32>, vector<32x128xf32>, vector<2x128xf32> -> vector<2x128xf32>
    %29 = arith.addf %27, %28 : vector<2x128xf32>
    %30 = arith.negf %29 : vector<2x128xf32>
    %31 = math.exp %30 : vector<2x128xf32>
    %cst_12 = arith.constant 1.000000e+00 : f32
    %32 = vector.broadcast %cst_12 : f32 to vector<2x128xf32>
    %33 = arith.addf %32, %31 : vector<2x128xf32>
    %34 = arith.divf %32, %33 : vector<2x128xf32>
    %35 = vector.extract_strided_slice %34 {offsets = [0, 0], sizes = [2, 32], strides = [1, 1]} : vector<2x128xf32> to vector<2x32xf32>
    %36 = vector.extract_strided_slice %34 {offsets = [0, 32], sizes = [2, 32], strides = [1, 1]} : vector<2x128xf32> to vector<2x32xf32>
    %37 = vector.extract_strided_slice %34 {offsets = [0, 96], sizes = [2, 32], strides = [1, 1]} : vector<2x128xf32> to vector<2x32xf32>
    %38 = vector.extract_strided_slice %29 {offsets = [0, 64], sizes = [2, 32], strides = [1, 1]} : vector<2x128xf32> to vector<2x32xf32>
    %39 = math.tanh %38 : vector<2x32xf32>
    %40 = arith.mulf %36, %24 : vector<2x32xf32>
    %41 = arith.mulf %35, %39 : vector<2x32xf32>
    %42 = arith.addf %40, %41 : vector<2x32xf32>
    %43 = math.tanh %42 : vector<2x32xf32>
    %44 = arith.mulf %37, %43 : vector<2x32xf32>
    %45 = vector.extract_strided_slice %5 {offsets = [4, 0], sizes = [2, 128], strides = [1, 1]} : vector<16x128xf32> to vector<2x128xf32>
    %cst_13 = arith.constant dense<0.000000e+00> : vector<2x128xf32>
    %46 = tpu.matmul %44, %6, %cst_13 {dimension_numbers = #tpu.dot_dimension_numbers<[1], [0], [0], [1], [0, 0, 1, 1], [], []>} : vector<2x32xf32>, vector<32x128xf32>, vector<2x128xf32> -> vector<2x128xf32>
    %47 = arith.addf %45, %46 : vector<2x128xf32>
    %48 = arith.negf %47 : vector<2x128xf32>
    %49 = math.exp %48 : vector<2x128xf32>
    %cst_14 = arith.constant 1.000000e+00 : f32
    %50 = vector.broadcast %cst_14 : f32 to vector<2x128xf32>
    %51 = arith.addf %50, %49 : vector<2x128xf32>
    %52 = arith.divf %50, %51 : vector<2x128xf32>
    %53 = vector.extract_strided_slice %52 {offsets = [0, 0], sizes = [2, 32], strides = [1, 1]} : vector<2x128xf32> to vector<2x32xf32>
    %54 = vector.extract_strided_slice %52 {offsets = [0, 32], sizes = [2, 32], strides = [1, 1]} : vector<2x128xf32> to vector<2x32xf32>
    %55 = vector.extract_strided_slice %52 {offsets = [0, 96], sizes = [2, 32], strides = [1, 1]} : vector<2x128xf32> to vector<2x32xf32>
    %56 = vector.extract_strided_slice %47 {offsets = [0, 64], sizes = [2, 32], strides = [1, 1]} : vector<2x128xf32> to vector<2x32xf32>
    %57 = math.tanh %56 : vector<2x32xf32>
    %58 = arith.mulf %54, %42 : vector<2x32xf32>
    %59 = arith.mulf %53, %57 : vector<2x32xf32>
    %60 = arith.addf %58, %59 : vector<2x32xf32>
    %61 = math.tanh %60 : vector<2x32xf32>
    %62 = arith.mulf %55, %61 : vector<2x32xf32>
    %63 = vector.extract_strided_slice %5 {offsets = [6, 0], sizes = [2, 128], strides = [1, 1]} : vector<16x128xf32> to vector<2x128xf32>
    %cst_15 = arith.constant dense<0.000000e+00> : vector<2x128xf32>
    %64 = tpu.matmul %62, %6, %cst_15 {dimension_numbers = #tpu.dot_dimension_numbers<[1], [0], [0], [1], [0, 0, 1, 1], [], []>} : vector<2x32xf32>, vector<32x128xf32>, vector<2x128xf32> -> vector<2x128xf32>
    %65 = arith.addf %63, %64 : vector<2x128xf32>
    %66 = arith.negf %65 : vector<2x128xf32>
    %67 = math.exp %66 : vector<2x128xf32>
    %cst_16 = arith.constant 1.000000e+00 : f32
    %68 = vector.broadcast %cst_16 : f32 to vector<2x128xf32>
    %69 = arith.addf %68, %67 : vector<2x128xf32>
    %70 = arith.divf %68, %69 : vector<2x128xf32>
    %71 = vector.extract_strided_slice %70 {offsets = [0, 0], sizes = [2, 32], strides = [1, 1]} : vector<2x128xf32> to vector<2x32xf32>
    %72 = vector.extract_strided_slice %70 {offsets = [0, 32], sizes = [2, 32], strides = [1, 1]} : vector<2x128xf32> to vector<2x32xf32>
    %73 = vector.extract_strided_slice %70 {offsets = [0, 96], sizes = [2, 32], strides = [1, 1]} : vector<2x128xf32> to vector<2x32xf32>
    %74 = vector.extract_strided_slice %65 {offsets = [0, 64], sizes = [2, 32], strides = [1, 1]} : vector<2x128xf32> to vector<2x32xf32>
    %75 = math.tanh %74 : vector<2x32xf32>
    %76 = arith.mulf %72, %60 : vector<2x32xf32>
    %77 = arith.mulf %71, %75 : vector<2x32xf32>
    %78 = arith.addf %76, %77 : vector<2x32xf32>
    %79 = math.tanh %78 : vector<2x32xf32>
    %80 = arith.mulf %73, %79 : vector<2x32xf32>
    %81 = vector.extract_strided_slice %5 {offsets = [8, 0], sizes = [2, 128], strides = [1, 1]} : vector<16x128xf32> to vector<2x128xf32>
    %cst_17 = arith.constant dense<0.000000e+00> : vector<2x128xf32>
    %82 = tpu.matmul %80, %6, %cst_17 {dimension_numbers = #tpu.dot_dimension_numbers<[1], [0], [0], [1], [0, 0, 1, 1], [], []>} : vector<2x32xf32>, vector<32x128xf32>, vector<2x128xf32> -> vector<2x128xf32>
    %83 = arith.addf %81, %82 : vector<2x128xf32>
    %84 = arith.negf %83 : vector<2x128xf32>
    %85 = math.exp %84 : vector<2x128xf32>
    %cst_18 = arith.constant 1.000000e+00 : f32
    %86 = vector.broadcast %cst_18 : f32 to vector<2x128xf32>
    %87 = arith.addf %86, %85 : vector<2x128xf32>
    %88 = arith.divf %86, %87 : vector<2x128xf32>
    %89 = vector.extract_strided_slice %88 {offsets = [0, 0], sizes = [2, 32], strides = [1, 1]} : vector<2x128xf32> to vector<2x32xf32>
    %90 = vector.extract_strided_slice %88 {offsets = [0, 32], sizes = [2, 32], strides = [1, 1]} : vector<2x128xf32> to vector<2x32xf32>
    %91 = vector.extract_strided_slice %88 {offsets = [0, 96], sizes = [2, 32], strides = [1, 1]} : vector<2x128xf32> to vector<2x32xf32>
    %92 = vector.extract_strided_slice %83 {offsets = [0, 64], sizes = [2, 32], strides = [1, 1]} : vector<2x128xf32> to vector<2x32xf32>
    %93 = math.tanh %92 : vector<2x32xf32>
    %94 = arith.mulf %90, %78 : vector<2x32xf32>
    %95 = arith.mulf %89, %93 : vector<2x32xf32>
    %96 = arith.addf %94, %95 : vector<2x32xf32>
    %97 = math.tanh %96 : vector<2x32xf32>
    %98 = arith.mulf %91, %97 : vector<2x32xf32>
    %99 = vector.extract_strided_slice %5 {offsets = [10, 0], sizes = [2, 128], strides = [1, 1]} : vector<16x128xf32> to vector<2x128xf32>
    %cst_19 = arith.constant dense<0.000000e+00> : vector<2x128xf32>
    %100 = tpu.matmul %98, %6, %cst_19 {dimension_numbers = #tpu.dot_dimension_numbers<[1], [0], [0], [1], [0, 0, 1, 1], [], []>} : vector<2x32xf32>, vector<32x128xf32>, vector<2x128xf32> -> vector<2x128xf32>
    %101 = arith.addf %99, %100 : vector<2x128xf32>
    %102 = arith.negf %101 : vector<2x128xf32>
    %103 = math.exp %102 : vector<2x128xf32>
    %cst_20 = arith.constant 1.000000e+00 : f32
    %104 = vector.broadcast %cst_20 : f32 to vector<2x128xf32>
    %105 = arith.addf %104, %103 : vector<2x128xf32>
    %106 = arith.divf %104, %105 : vector<2x128xf32>
    %107 = vector.extract_strided_slice %106 {offsets = [0, 0], sizes = [2, 32], strides = [1, 1]} : vector<2x128xf32> to vector<2x32xf32>
    %108 = vector.extract_strided_slice %106 {offsets = [0, 32], sizes = [2, 32], strides = [1, 1]} : vector<2x128xf32> to vector<2x32xf32>
    %109 = vector.extract_strided_slice %106 {offsets = [0, 96], sizes = [2, 32], strides = [1, 1]} : vector<2x128xf32> to vector<2x32xf32>
    %110 = vector.extract_strided_slice %101 {offsets = [0, 64], sizes = [2, 32], strides = [1, 1]} : vector<2x128xf32> to vector<2x32xf32>
    %111 = math.tanh %110 : vector<2x32xf32>
    %112 = arith.mulf %108, %96 : vector<2x32xf32>
    %113 = arith.mulf %107, %111 : vector<2x32xf32>
    %114 = arith.addf %112, %113 : vector<2x32xf32>
    %115 = math.tanh %114 : vector<2x32xf32>
    %116 = arith.mulf %109, %115 : vector<2x32xf32>
    %117 = vector.extract_strided_slice %5 {offsets = [12, 0], sizes = [2, 128], strides = [1, 1]} : vector<16x128xf32> to vector<2x128xf32>
    %cst_21 = arith.constant dense<0.000000e+00> : vector<2x128xf32>
    %118 = tpu.matmul %116, %6, %cst_21 {dimension_numbers = #tpu.dot_dimension_numbers<[1], [0], [0], [1], [0, 0, 1, 1], [], []>} : vector<2x32xf32>, vector<32x128xf32>, vector<2x128xf32> -> vector<2x128xf32>
    %119 = arith.addf %117, %118 : vector<2x128xf32>
    %120 = arith.negf %119 : vector<2x128xf32>
    %121 = math.exp %120 : vector<2x128xf32>
    %cst_22 = arith.constant 1.000000e+00 : f32
    %122 = vector.broadcast %cst_22 : f32 to vector<2x128xf32>
    %123 = arith.addf %122, %121 : vector<2x128xf32>
    %124 = arith.divf %122, %123 : vector<2x128xf32>
    %125 = vector.extract_strided_slice %124 {offsets = [0, 0], sizes = [2, 32], strides = [1, 1]} : vector<2x128xf32> to vector<2x32xf32>
    %126 = vector.extract_strided_slice %124 {offsets = [0, 32], sizes = [2, 32], strides = [1, 1]} : vector<2x128xf32> to vector<2x32xf32>
    %127 = vector.extract_strided_slice %124 {offsets = [0, 96], sizes = [2, 32], strides = [1, 1]} : vector<2x128xf32> to vector<2x32xf32>
    %128 = vector.extract_strided_slice %119 {offsets = [0, 64], sizes = [2, 32], strides = [1, 1]} : vector<2x128xf32> to vector<2x32xf32>
    %129 = math.tanh %128 : vector<2x32xf32>
    %130 = arith.mulf %126, %114 : vector<2x32xf32>
    %131 = arith.mulf %125, %129 : vector<2x32xf32>
    %132 = arith.addf %130, %131 : vector<2x32xf32>
    %133 = math.tanh %132 : vector<2x32xf32>
    %134 = arith.mulf %127, %133 : vector<2x32xf32>
    %135 = vector.extract_strided_slice %5 {offsets = [14, 0], sizes = [2, 128], strides = [1, 1]} : vector<16x128xf32> to vector<2x128xf32>
    %cst_23 = arith.constant dense<0.000000e+00> : vector<2x128xf32>
    %136 = tpu.matmul %134, %6, %cst_23 {dimension_numbers = #tpu.dot_dimension_numbers<[1], [0], [0], [1], [0, 0, 1, 1], [], []>} : vector<2x32xf32>, vector<32x128xf32>, vector<2x128xf32> -> vector<2x128xf32>
    %137 = arith.addf %135, %136 : vector<2x128xf32>
    %138 = arith.negf %137 : vector<2x128xf32>
    %139 = math.exp %138 : vector<2x128xf32>
    %cst_24 = arith.constant 1.000000e+00 : f32
    %140 = vector.broadcast %cst_24 : f32 to vector<2x128xf32>
    %141 = arith.addf %140, %139 : vector<2x128xf32>
    %142 = arith.divf %140, %141 : vector<2x128xf32>
    %143 = vector.extract_strided_slice %142 {offsets = [0, 0], sizes = [2, 32], strides = [1, 1]} : vector<2x128xf32> to vector<2x32xf32>
    %144 = vector.extract_strided_slice %142 {offsets = [0, 32], sizes = [2, 32], strides = [1, 1]} : vector<2x128xf32> to vector<2x32xf32>
    %145 = vector.extract_strided_slice %142 {offsets = [0, 96], sizes = [2, 32], strides = [1, 1]} : vector<2x128xf32> to vector<2x32xf32>
    %146 = vector.extract_strided_slice %137 {offsets = [0, 64], sizes = [2, 32], strides = [1, 1]} : vector<2x128xf32> to vector<2x32xf32>
    %147 = math.tanh %146 : vector<2x32xf32>
    %148 = arith.mulf %144, %132 : vector<2x32xf32>
    %149 = arith.mulf %143, %147 : vector<2x32xf32>
    %150 = arith.addf %148, %149 : vector<2x32xf32>
    %151 = math.tanh %150 : vector<2x32xf32>
    %152 = arith.mulf %145, %151 : vector<2x32xf32>
    %153 = tpu.concatenate %26, %44, %62, %80, %98, %116, %134, %152 in 0 : vector<2x32xf32>, vector<2x32xf32>, vector<2x32xf32>, vector<2x32xf32>, vector<2x32xf32>, vector<2x32xf32>, vector<2x32xf32>, vector<2x32xf32> -> vector<16x32xf32>
    %c0_25 = arith.constant 0 : index
    %c0_26 = arith.constant 0 : index
    %154 = vector.load %arg5[%c0_25, %c0_26] : memref<32x8xf32, #tpu.memory_space<vmem>>, vector<32x8xf32>
    %cst_27 = arith.constant dense<0.000000e+00> : vector<16x8xf32>
    %155 = tpu.matmul %153, %154, %cst_27 {dimension_numbers = #tpu.dot_dimension_numbers<[1], [0], [0], [1], [0, 0, 1, 1], [], []>} : vector<16x32xf32>, vector<32x8xf32>, vector<16x8xf32> -> vector<16x8xf32>
    %c0_28 = arith.constant 0 : index
    %c0_29 = arith.constant 0 : index
    %156 = vector.load %arg6[%c0_28, %c0_29] : memref<1x8xf32, #tpu.memory_space<vmem>>, vector<1x8xf32>
    %157 = vector.broadcast %156 : vector<1x8xf32> to vector<16x8xf32>
    %158 = arith.addf %155, %157 : vector<16x8xf32>
    %c0_30 = arith.constant 0 : index
    %c0_31 = arith.constant 0 : index
    %159 = vector.load %arg7[%c0_30, %c0_31] : memref<16x8xf32, #tpu.memory_space<vmem>>, vector<16x8xf32>
    tpu.vector_store %arg7[%c0_30, %c0_31], %158 {strides = array<i32>} : memref<16x8xf32, #tpu.memory_space<vmem>>, vector<16x8xf32>,
    return
  }
  func.func @transform_0(%arg0: i32) -> (i32, i32) {
    %c0_i32 = arith.constant 0 : i32
    %c0_i32_0 = arith.constant 0 : i32
    %c0_i32_1 = arith.constant 0 : i32
    return %c0_i32, %c0_i32_0 : i32, i32
  }
  func.func @transform_1(%arg0: i32) -> (i32, i32) {
    %c0_i32 = arith.constant 0 : i32
    %c0_i32_0 = arith.constant 0 : i32
    %c0_i32_1 = arith.constant 0 : i32
    return %c0_i32, %c0_i32_0 : i32, i32
  }
  func.func @transform_2(%arg0: i32) -> (i32, i32) {
    %c0_i32 = arith.constant 0 : i32
    %c0_i32_0 = arith.constant 0 : i32
    %c0_i32_1 = arith.constant 0 : i32
    return %c0_i32, %c0_i32_0 : i32, i32
  }
  func.func @transform_3(%arg0: i32) -> (i32, i32) {
    %c0_i32 = arith.constant 0 : i32
    %c0_i32_0 = arith.constant 0 : i32
    %c0_i32_1 = arith.constant 0 : i32
    return %c0_i32, %c0_i32_0 : i32, i32
  }
  func.func @transform_4(%arg0: i32) -> (i32, i32) {
    %c0_i32 = arith.constant 0 : i32
    %c0_i32_0 = arith.constant 0 : i32
    %c0_i32_1 = arith.constant 0 : i32
    return %c0_i32, %c0_i32_0 : i32, i32
  }
  func.func @transform_5(%arg0: i32) -> (i32, i32) {
    %c0_i32 = arith.constant 0 : i32
    %c0_i32_0 = arith.constant 0 : i32
    %c0_i32_1 = arith.constant 0 : i32
    return %c0_i32, %c0_i32_0 : i32, i32
  }
  func.func @transform_6(%arg0: i32) -> (i32, i32) {
    %c0_i32 = arith.constant 0 : i32
    %c0_i32_0 = arith.constant 0 : i32
    %c0_i32_1 = arith.constant 0 : i32
    return %c0_i32, %c0_i32_0 : i32, i32
  }
}

</mosaic_0001>

<bundles_post_ra>
// kernel: tpu_custom_call.1
= control target key start
LH: loop header
LB: loop body
LE: loop exit
PB: predicated region body
PF: predicated region fallthrough
CT: control target
= control target key end

     0   :  { %11 = vsyncpa [#allocation3], 0  ;;  %s1693_s0 = inlined_call_operand.hbm [shape: f32[16,16], index: 0, kind: input, shape index: {}]   ;;  %s1694_s1 = inlined_call_operand.hbm [shape: f32[16,128], index: 1, kind: input, shape index: {}]   ;;  %s1695_s2 = inlined_call_operand.vmem [shape: f32[32,128], index: 2, kind: input, shape index: {}]   ;;  %s1696_s3 = inlined_call_operand.vmem [shape: f32[1,128], index: 3, kind: input, shape index: {}]   ;;  %s1697_s4 = inlined_call_operand.vmem [shape: f32[32,8], index: 4, kind: input, shape index: {}]   ;;  %s1698_s5 = inlined_call_operand.vmem [shape: f32[1,8], index: 5, kind: input, shape index: {}]   ;;  %s1699_s6 = inlined_call_operand.vmem [shape: f32[16,8], index: 6, kind: output, shape index: {}]  }
   0x1   :  { %12 = vsyncpa [#allocation5], 0  ;;  %s1463_s21 = smov [#allocation2]   ;;  %s1415_s25 = scalar_lea.hbm %s1693_s0, 256 }
   0x2   :  { %s18_s22 = sshll.u32 %s1463_s21, 4  ;;  %p1416_p0 = scmp.ne.s32.totalorder %s1693_s0, %s1415_s25  ;;  %s19_s22 = int_to_ptr.vmem [resolvable:$true] %s18_s22 }
   0x3   :  { %p1419_p1 = scmp.lt.u32.totalorder %s1415_s25, %s1693_s0 }
   0x5   :  { %p1421_p2 = pnand %p1419_p1, %p1416_p0 }
   0x7   :  { %1424 = shalt.err (!%p1421_p2)
}
   0x8   :  { %s1425_s30 = scalar_lea.vmem %s19_s22, 256  ;;  %p1430_p4 = scmp.lt.s32.totalorder %s19_s22, %s19_s22 }
   0x9   :  { %p1426_p3 = scmp.ne.s32.totalorder %s19_s22, %s1425_s30  ;;  %p1431_p5 = scmp.lt.s32.totalorder %s1425_s30, %s1425_s30 }
   0xb   :  { %p1432_p6 = por %p1431_p5, %p1430_p4 }
   0xd   :  { %p1433_p7 = pnand %p1432_p6, %p1426_p3 }
   0xf   :  { %1436 = shalt.err (!%p1433_p7)
}
  0x10   :  { %s1464_s7 = smov 128   ;;  %s1465_s8 = smov 8  }
  0x11   :  { %24 = dma.hbm_to_vmem [thread:$0]  %s1693_s0, 256, %s19_s22, [#allocation3], %s1464_s7, %s1464_s7, %s1465_s8  }
  0x12   :  { %s1466_s11 = smov [#allocation4]   ;;  %s1437_s15 = scalar_lea.hbm %s1694_s1, 256 }
  0x13   :  { %s30_s12 = sshll.u32 %s1466_s11, 4  ;;  %p1438_p8 = scmp.ne.s32.totalorder %s1694_s1, %s1437_s15  ;;  %s31_s12 = int_to_ptr.vmem [resolvable:$true] %s30_s12 }
  0x14   :  { %p1441_p9 = scmp.lt.u32.totalorder %s1437_s15, %s1694_s1 }
  0x16   :  { %p1443_p10 = pnand %p1441_p9, %p1438_p8 }
  0x18   :  { %1446 = shalt.err (!%p1443_p10)
}
  0x19   :  { %s1447_s20 = scalar_lea.vmem %s31_s12, 256  ;;  %p1452_p12 = scmp.lt.s32.totalorder %s31_s12, %s31_s12 }
  0x1a   :  { %p1448_p11 = scmp.ne.s32.totalorder %s31_s12, %s1447_s20  ;;  %p1453_p13 = scmp.lt.s32.totalorder %s1447_s20, %s1447_s20 }
  0x1c   :  { %p1454_p0 = por %p1453_p13, %p1452_p12 }
  0x1e   :  { %p1455_p1 = pnand %p1454_p0, %p1448_p11 }
  0x20   :  { %1458 = shalt.err (!%p1455_p1)
}
  0x21   :  { %36 = dma.hbm_to_vmem [thread:$0]  %s1694_s1, 256, %s31_s12, [#allocation5], %s1464_s7, %s1464_s7, %s1465_s8  }
  0x22   :  { %1459 = dma.done.wait [#allocation3], 256  }
  0x23   :  { %1460 = vsyncadd [#allocation3], 4294967040 }
  0x24   :  { %1461 = dma.done.wait [#allocation5], 256  }
  0x25   :  { %1462 = vsyncadd [#allocation5], 4294967040  ;;  %v1467_v0 = vmov 0.0|0.0   ;;  %vm1468_vm0 = vmmov 0   ;;  %v1469_v1 = vmov 0.0   ;;  %vm62_vm1 = vcmask 130048  }
  0x26   :  { %1286 = vmatprep.subr.bf16.mxu1 %v1467_v0  ;;  %1191 = vmatprep.mubr.msk.f32.mxu1 %vm1468_vm0, %v1469_v1  ;;  %v53_v2 = vld [vmem:[#allocation4] sm:$0xff]  ;;  %v54_v3 = vld [vmem:[#allocation4 + $0x8] sm:$0xff]  ;;  %v144_v4 = vld [vmem:[%s1695_s2] sm:$0xff]  ;;  %s1470_s30 = smov 64   ;;  %vm148_vm2 = vcmask 261120   ;;  %vm991_vm3 = vcmask 1041408  }
  0x27   :  { %v1282_v5 = vpack.c.bf16 %v54_v3, %v53_v2  ;;  %v145_v6 = vld [vmem:[%s1695_s2 + $0x8] sm:$0xff]  ;;  %v51_v7 = vld [vmem:[#allocation2] sm:$0xff]  ;;  %v146_v9 = vld [vmem:[%s1695_s2 + $0x10] sm:$0xff]  ;;  %vm993_vm4 = vcmask 1043456   ;;  %vm995_vm5 = vcmask 1045504   ;;  %vm1096_vm6 = vcmask 64512  }
  0x28   :  { %v1540_v8 = vpack.c.bf16 %v145_v6, %v144_v4  ;;  %1180 = vmatprep.mubr.msk.f32.mxu0 %vm62_vm1, %v51_v7  ;;  %v147_v10 = vld [vmem:[%s1695_s2 + $0x18] sm:$0xff]  ;;  %v52_v11 = vld [vmem:[#allocation2 + $0x8] sm:$0xff]  ;;  %v1105_v13 = vld [vmem:[%s1696_s3] ss:$0 sm:$0xff]  ;;  %s1471_s3 = smov 32  }
  0x29   :  { %1283 = vmatprep.subr.bf16.mxu0 %v1282_v5  ;;  %v1550_v12 = vpack.c.bf16 %v147_v10, %v146_v9 }
  0x2a   :  { %1288 = vmatpush3.bf16.msra.mxu1 %v1540_v8  ;;  %1285 = vmatpush3.bf16.msra.mxu0 %v1282_v5 }
  0x2b   :  { %1289 = vmatprep.subr.bf16.mxu1 %v1467_v0  ;;  %1292 = vmatprep.subr.bf16.mxu0 %v1467_v0 }
  0x2d   :  { %1181 = vmatmul.mubr.msk.f32.vlgmr.msra.gmra.mrb[0].mxu0 %vm62_vm1, %v52_v11 }
  0x2e   :  { %1291 = vmatpush3.bf16.msra.mxu1 %v1550_v12  ;;  %1294 = vmatpush3.bf16.msra.mxu0 %v1540_v8 }
  0x2f   :  { %1295 = vmatprep.subr.bf16.mxu0 %v1467_v0  ;;  %1202 = vmatprep.mubr.msk.f32.mxu0 %vm1468_vm0, %v1469_v1 }
  0x30   :  { %1298 = vmatprep.subr.bf16.mxu1 %v1467_v0 }
  0x31   :  { %1192 = vmatmul.mubr.f32.vlgmr.msra.gmra.mrb[0].mxu1 %v1469_v1 }
  0x32   :  { %1297 = vmatpush3.bf16.msra.mxu0 %v1550_v12  ;;  %1300 = vmatpush3.bf16.msra.mxu1 %v1540_v8 }
  0x33   :  { %1301 = vmatprep.subr.bf16.mxu1 %v1467_v0  ;;  %1213 = vmatprep.mubr.msk.f32.mxu1 %vm1468_vm0, %v1469_v1 }
  0x34   :  { %1304 = vmatprep.subr.bf16.mxu0 %v1467_v0 }
  0x36   :  { %1303 = vmatpush3.bf16.msra.mxu1 %v1550_v12 }
  0x37   :  { %1310 = vmatprep.subr.bf16.mxu1 %v1467_v0 }
 0x100   :  { %v1182_v14 = vpop.f32.mrb[0].mxu0 }
 0x101   :  { %v1573_v15 = vadd.f32 %v1182_v14, %v1105_v13  ;;  %v135_v16 = vpop.f32.mrb[1].mxu0 }
 0x102   :  { %v1575_v17 = vadd.f32 %v1105_v13, %v135_v16 }
 0x104   :  { %v218_v18 = vpop.f32.mrb[0].mxu1 }
 0x105   :  { %v222_v19 = vadd.f32 %v218_v18, %v1575_v17  ;;  %v1193_v20 = vpop.f32.mrb[1].mxu1 }
 0x107   :  { %1351 = vtanh.f32 %v222_v19  ;;  %v1108_v22 = vmul.f32 -1.442695, %v222_v19 }
 0x109   :  { %1353 = vpow2.f32 %v1108_v22 }
 0x111   :  { %v1352_v21 = vpop.eup %1351 }
 0x112   :  { %232 = vrot.lane.b32.xlu0 %v1352_v21, %s1470_s30 }
 0x113   :  { %v1354_v23 = vpop.eup %1353 }
 0x114   :  { %v226_v24 = vadd.f32 1.0, %v1354_v23 }
 0x116   :  { %1355 = vrcp.f32 %v226_v24 }
 0x120   :  { %v1356_v25 = vpop.eup %1355 }
 0x121   :  { %v230_v28 = vmul.f32 0.0, %v1356_v25 }
 0x184   :  { %v233_v26 = vpop.permute.xlu0 %232 }
 0x185   :  { %v235_v27 = vmul.f32 %v1356_v25, %v233_v26 }
 0x187   :  { %237 = vrot.lane.b32.xlu0 %v235_v27, %s1471_s3 }
 0x1f9   :  { %v238_v29 = vpop.permute.xlu0 %237 }
 0x1fa   :  { %v240_v30 = vadd.f32 %v238_v29, %v230_v28 }
 0x1fc   :  { %1357 = vtanh.f32 %v240_v30  ;;  %v334_v46 = vrot.slane %v240_v30, 6 }
 0x206   :  { %v1358_v31 = vpop.eup %1357 }
 0x207   :  { %243 = vrot.lane.b32.xlu1 %v1358_v31, %s1470_s30 }
 0x279   :  { %v244_v32 = vpop.permute.xlu1 %243 }
 0x27a   :  { %v1581_v33 = vmul.f32 %v1356_v25, %v244_v32 }
 0x27c   :  { %248 = vrot.lane.b32.xlu1 %v1581_v33, %s1471_s3 }
 0x2ee   :  { %v249_v34 = vpop.permute.xlu1 %248 }
 0x2ef   :  { %1203 = vmatmul.mubr.msk.f32.vlgmr.msra.gmra.mrb[2].mxu0 %vm148_vm2, %v249_v34 }
 0x2f0   :  { %1306 = vmatpush3.bf16.msra.mxu0 %v1540_v8  ;;  %1224 = vmatprep.mubr.msk.f32.mxu0 %vm1468_vm0, %v1469_v1 }
 0x2f1   :  { %1307 = vmatprep.subr.bf16.mxu0 %v1467_v0 }
 0x2f4   :  { %1309 = vmatpush3.bf16.msra.mxu0 %v1550_v12 }
 0x2f5   :  { %1316 = vmatprep.subr.bf16.mxu0 %v1467_v0 }
 0x3c2   :  { %v318_v35 = vpop.f32.mrb[2].mxu0 }
 0x3c3   :  { %v323_v36 = vrot.slane %v318_v35, 6  ;;  %v1204_v37 = vpop.f32.mrb[3].mxu0 }
 0x3c5   :  { %v325_v38 = vadd.f32 %v323_v36, %v1575_v17 }
 0x3c7   :  { %1359 = vtanh.f32 %v325_v38  ;;  %v1110_v40 = vmul.f32 -1.442695, %v325_v38 }
 0x3c9   :  { %1361 = vpow2.f32 %v1110_v40 }
 0x3d1   :  { %v1360_v39 = vpop.eup %1359 }
 0x3d2   :  { %338 = vrot.lane.b32.xlu0 %v1360_v39, %s1470_s30 }
 0x3d3   :  { %v1362_v41 = vpop.eup %1361 }
 0x3d4   :  { %v329_v42 = vadd.f32 1.0, %v1362_v41 }
 0x3d6   :  { %1363 = vrcp.f32 %v329_v42 }
 0x3e0   :  { %v1364_v43 = vpop.eup %1363 }
 0x3e1   :  { %v336_v47 = vmul.f32 %v1364_v43, %v334_v46 }
 0x444   :  { %v339_v44 = vpop.permute.xlu0 %338 }
 0x445   :  { %v341_v45 = vmul.f32 %v1364_v43, %v339_v44 }
 0x447   :  { %343 = vrot.lane.b32.xlu1 %v341_v45, %s1471_s3 }
 0x4b9   :  { %v344_v48 = vpop.permute.xlu1 %343 }
 0x4ba   :  { %v346_v49 = vadd.f32 %v344_v48, %v336_v47 }
 0x4bc   :  { %1365 = vtanh.f32 %v346_v49  ;;  %v441_v4 = vrot.slane %v346_v49, 6 }
 0x4c6   :  { %v1366_v50 = vpop.eup %1365 }
 0x4c7   :  { %349 = vrot.lane.b32.xlu0 %v1366_v50, %s1470_s30 }
 0x539   :  { %v350_v51 = vpop.permute.xlu0 %349 }
 0x53a   :  { %v352_v52 = vmul.f32 %v1364_v43, %v350_v51 }
 0x53c   :  { %v354_v53 = vrot.slane %v352_v52, 2  ;;  %v992_v13 = vsel %vm991_vm3, %v1581_v33, %v352_v52 }
 0x53e   :  { %355 = vrot.lane.b32.xlu1 %v354_v53, %s1471_s3 }
 0x5b0   :  { %v356_v54 = vpop.permute.xlu1 %355 }
 0x5b1   :  { %1214 = vmatmul.mubr.msk.f32.vlgmr.msra.gmra.mrb[2].mxu1 %vm148_vm2, %v356_v54 }
 0x5b2   :  { %1312 = vmatpush3.bf16.msra.mxu1 %v1540_v8  ;;  %1235 = vmatprep.mubr.msk.f32.mxu1 %vm1468_vm0, %v1469_v1 }
 0x5b3   :  { %1313 = vmatprep.subr.bf16.mxu1 %v1467_v0 }
 0x5b6   :  { %1315 = vmatpush3.bf16.msra.mxu1 %v1550_v12 }
 0x5b7   :  { %1322 = vmatprep.subr.bf16.mxu1 %v1467_v0 }
 0x684   :  { %v425_v55 = vpop.f32.mrb[2].mxu1 }
 0x685   :  { %v430_v56 = vrot.slane %v425_v55, 4  ;;  %v1215_v57 = vpop.f32.mrb[3].mxu1 }
 0x687   :  { %v432_v58 = vadd.f32 %v430_v56, %v1575_v17 }
 0x689   :  { %1367 = vtanh.f32 %v432_v58  ;;  %v1112_v60 = vmul.f32 -1.442695, %v432_v58 }
 0x68b   :  { %1369 = vpow2.f32 %v1112_v60 }
 0x693   :  { %v1368_v59 = vpop.eup %1367 }
 0x694   :  { %445 = vrot.lane.b32.xlu0 %v1368_v59, %s1470_s30 }
 0x695   :  { %v1370_v61 = vpop.eup %1369 }
 0x696   :  { %v436_v62 = vadd.f32 1.0, %v1370_v61 }
 0x698   :  { %1371 = vrcp.f32 %v436_v62 }
 0x6a2   :  { %v1372_v63 = vpop.eup %1371 }
 0x6a3   :  { %v443_v5 = vmul.f32 %v1372_v63, %v441_v4 }
 0x706   :  { %v446_v2 = vpop.permute.xlu0 %445 }
 0x707   :  { %v448_v3 = vmul.f32 %v1372_v63, %v446_v2 }
 0x709   :  { %450 = vrot.lane.b32.xlu1 %v448_v3, %s1471_s3 }
 0x77b   :  { %v451_v6 = vpop.permute.xlu1 %450 }
 0x77c   :  { %v453_v7 = vadd.f32 %v451_v6, %v443_v5 }
 0x77e   :  { %1373 = vtanh.f32 %v453_v7  ;;  %v548_v30 = vrot.slane %v453_v7, 6 }
 0x788   :  { %v1374_v9 = vpop.eup %1373 }
 0x789   :  { %456 = vrot.lane.b32.xlu0 %v1374_v9, %s1470_s30 }
 0x7fb   :  { %v457_v10 = vpop.permute.xlu0 %456 }
 0x7fc   :  { %v459_v11 = vmul.f32 %v1372_v63, %v457_v10 }
 0x7fe   :  { %v461_v14 = vrot.slane %v459_v11, 4  ;;  %v994_v16 = vsel %vm993_vm4, %v992_v13, %v459_v11 }
 0x800   :  { %462 = vrot.lane.b32.xlu1 %v461_v14, %s1471_s3 }
 0x872   :  { %v463_v18 = vpop.permute.xlu1 %462 }
 0x873   :  { %1225 = vmatmul.mubr.msk.f32.vlgmr.msra.gmra.mrb[4].mxu0 %vm148_vm2, %v463_v18 }
 0x874   :  { %1318 = vmatpush3.bf16.msra.mxu0 %v1540_v8  ;;  %1246 = vmatprep.mubr.msk.f32.mxu0 %vm1468_vm0, %v1469_v1 }
 0x875   :  { %1319 = vmatprep.subr.bf16.mxu0 %v1467_v0 }
 0x878   :  { %1321 = vmatpush3.bf16.msra.mxu0 %v1550_v12 }
 0x879   :  { %1328 = vmatprep.subr.bf16.mxu0 %v1467_v0 }
 0x946   :  { %v532_v19 = vpop.f32.mrb[4].mxu0 }
 0x947   :  { %v537_v20 = vrot.slane %v532_v19, 2  ;;  %v1226_v21 = vpop.f32.mrb[5].mxu0 }
 0x949   :  { %v539_v22 = vadd.f32 %v537_v20, %v1575_v17 }
 0x94b   :  { %1375 = vtanh.f32 %v539_v22  ;;  %v1114_v24 = vmul.f32 -1.442695, %v539_v22 }
 0x94d   :  { %1377 = vpow2.f32 %v1114_v24 }
 0x955   :  { %v1376_v23 = vpop.eup %1375 }
 0x956   :  { %552 = vrot.lane.b32.xlu0 %v1376_v23, %s1470_s30 }
 0x957   :  { %v1378_v25 = vpop.eup %1377 }
 0x958   :  { %v543_v26 = vadd.f32 1.0, %v1378_v25 }
 0x95a   :  { %1379 = vrcp.f32 %v543_v26 }
 0x964   :  { %v1380_v27 = vpop.eup %1379 }
 0x965   :  { %v550_v31 = vmul.f32 %v1380_v27, %v548_v30 }
 0x9c8   :  { %v553_v28 = vpop.permute.xlu0 %552 }
 0x9c9   :  { %v555_v29 = vmul.f32 %v1380_v27, %v553_v28 }
 0x9cb   :  { %557 = vrot.lane.b32.xlu1 %v555_v29, %s1471_s3 }
 0xa3d   :  { %v558_v32 = vpop.permute.xlu1 %557 }
 0xa3e   :  { %v560_v33 = vadd.f32 %v558_v32, %v550_v31 }
 0xa40   :  { %1381 = vtanh.f32 %v560_v33  ;;  %v652_v49 = vrot.slane %v560_v33, 6 }
 0xa4a   :  { %v1382_v17 = vpop.eup %1381 }
 0xa4b   :  { %563 = vrot.lane.b32.xlu0 %v1382_v17, %s1470_s30 }
 0xabd   :  { %v564_v34 = vpop.permute.xlu0 %563 }
 0xabe   :  { %v566_v35 = vmul.f32 %v1380_v27, %v564_v34 }
 0xac0   :  { %v568_v36 = vrot.slane %v566_v35, 6  ;;  %v1624_v37 = vsel %vm995_vm5, %v994_v16, %v566_v35 }
 0xac2   :  { %569 = vrot.lane.b32.xlu1 %v568_v36, %s1471_s3 }
 0xb34   :  { %v570_v38 = vpop.permute.xlu1 %569 }
 0xb35   :  { %1236 = vmatmul.mubr.msk.f32.vlgmr.msra.gmra.mrb[4].mxu1 %vm148_vm2, %v570_v38 }
 0xb36   :  { %1324 = vmatpush3.bf16.msra.mxu1 %v1540_v8  ;;  %1257 = vmatprep.mubr.msk.f32.mxu1 %vm1468_vm0, %v1469_v1 }
 0xb37   :  { %1325 = vmatprep.subr.bf16.mxu1 %v1467_v0 }
 0xb3a   :  { %1327 = vmatpush3.bf16.msra.mxu1 %v1550_v12 }
 0xc08   :  { %v639_v39 = vpop.f32.mrb[4].mxu1 }
 0xc09   :  { %v643_v40 = vadd.f32 %v639_v39, %v1573_v15  ;;  %v1237_v41 = vpop.f32.mrb[5].mxu1 }
 0xc0b   :  { %1383 = vtanh.f32 %v643_v40  ;;  %v1116_v43 = vmul.f32 -1.442695, %v643_v40 }
 0xc0d   :  { %1385 = vpow2.f32 %v1116_v43 }
 0xc15   :  { %v1384_v42 = vpop.eup %1383 }
 0xc16   :  { %656 = vrot.lane.b32.xlu0 %v1384_v42, %s1470_s30 }
 0xc17   :  { %v1386_v44 = vpop.eup %1385 }
 0xc18   :  { %v647_v45 = vadd.f32 1.0, %v1386_v44 }
 0xc1a   :  { %1387 = vrcp.f32 %v647_v45 }
 0xc24   :  { %v1388_v46 = vpop.eup %1387 }
 0xc25   :  { %v654_v50 = vmul.f32 %v1388_v46, %v652_v49 }
 0xc88   :  { %v657_v47 = vpop.permute.xlu0 %656 }
 0xc89   :  { %v659_v48 = vmul.f32 %v1388_v46, %v657_v47 }
 0xc8b   :  { %661 = vrot.lane.b32.xlu1 %v659_v48, %s1471_s3 }
 0xcfd   :  { %v662_v51 = vpop.permute.xlu1 %661 }
 0xcfe   :  { %v664_v52 = vadd.f32 %v662_v51, %v654_v50 }
 0xd00   :  { %1389 = vtanh.f32 %v664_v52 }
 0xd0a   :  { %v1390_v53 = vpop.eup %1389 }
 0xd0b   :  { %667 = vrot.lane.b32.xlu0 %v1390_v53, %s1470_s30  ;;  %v1001_v53 = vld [vmem:[%s1697_s4 + $0x8] sm:$0xff] }
 0xd7d   :  { %v668_v54 = vpop.permute.xlu0 %667 }
 0xd7e   :  { %v1637_v55 = vmul.f32 %v1388_v46, %v668_v54  ;;  %v1002_v54 = vld [vmem:[%s1697_s4 + $0x10] sm:$0xff] }
 0xd80   :  { %672 = vrot.lane.b32.xlu1 %v1637_v55, %s1471_s3 }
 0xdf2   :  { %v673_v56 = vpop.permute.xlu1 %672 }
 0xdf3   :  { %1247 = vmatmul.mubr.msk.f32.vlgmr.msra.gmra.mrb[6].mxu0 %vm148_vm2, %v673_v56 }
 0xdf4   :  { %1330 = vmatpush3.bf16.msra.mxu0 %v1540_v8  ;;  %1268 = vmatprep.mubr.msk.f32.mxu0 %vm1468_vm0, %v1469_v1 }
 0xdf5   :  { %1331 = vmatprep.subr.bf16.mxu0 %v1467_v0  ;;  %v758_v0 = vrot.slane %v664_v52, 6  ;;  %v1000_v52 = vld [vmem:[%s1697_s4] sm:$0xff] }
 0xdf8   :  { %1333 = vmatpush3.bf16.msra.mxu0 %v1550_v12 }
 0xec6   :  { %v742_v57 = vpop.f32.mrb[6].mxu0 }
 0xec7   :  { %v747_v58 = vrot.slane %v742_v57, 6  ;;  %v1248_v59 = vpop.f32.mrb[7].mxu0 }
 0xec9   :  { %v749_v60 = vadd.f32 %v747_v58, %v1573_v15 }
 0xecb   :  { %1391 = vtanh.f32 %v749_v60  ;;  %v1118_v62 = vmul.f32 -1.442695, %v749_v60 }
 0xecd   :  { %1393 = vpow2.f32 %v1118_v62  ;;  %v1123_v62 = vld [vmem:[%s1698_s5] ss:$0 sm:$0xff] }
 0xed5   :  { %v1392_v61 = vpop.eup %1391 }
 0xed6   :  { %762 = vrot.lane.b32.xlu0 %v1392_v61, %s1470_s30 }
 0xed7   :  { %v1394_v63 = vpop.eup %1393 }
 0xed8   :  { %v753_v8 = vadd.f32 1.0, %v1394_v63 }
 0xeda   :  { %1395 = vrcp.f32 %v753_v8 }
 0xee4   :  { %v1396_v2 = vpop.eup %1395 }
 0xee5   :  { %v760_v12 = vmul.f32 %v1396_v2, %v758_v0 }
 0xf48   :  { %v763_v1 = vpop.permute.xlu0 %762 }
 0xf49   :  { %v765_v3 = vmul.f32 %v1396_v2, %v763_v1 }
 0xf4b   :  { %767 = vrot.lane.b32.xlu1 %v765_v3, %s1471_s3 }
 0xfbd   :  { %v768_v4 = vpop.permute.xlu1 %767 }
 0xfbe   :  { %v770_v5 = vadd.f32 %v768_v4, %v760_v12 }
 0xfc0   :  { %1397 = vtanh.f32 %v770_v5  ;;  %v865_v26 = vrot.slane %v770_v5, 6 }
 0xfca   :  { %v1398_v6 = vpop.eup %1397 }
 0xfcb   :  { %773 = vrot.lane.b32.xlu0 %v1398_v6, %s1470_s30 }
0x103d   :  { %v774_v7 = vpop.permute.xlu0 %773 }
0x103e   :  { %v776_v9 = vmul.f32 %v1396_v2, %v774_v7 }
0x1040   :  { %v778_v10 = vrot.slane %v776_v9, 2  ;;  %v997_v33 = vsel %vm991_vm3, %v1637_v55, %v776_v9  ;;  %v1003_v55 = vld [vmem:[%s1697_s4 + $0x18] sm:$0xff] }
0x1041   :  { %v1338_v56 = vpack.c.bf16 %v1003_v55, %v1002_v54 }
0x1042   :  { %779 = vrot.lane.b32.xlu1 %v778_v10, %s1471_s3 }
0x10b4   :  { %v780_v11 = vpop.permute.xlu1 %779 }
0x10b5   :  { %1258 = vmatmul.mubr.msk.f32.vlgmr.msra.gmra.mrb[6].mxu1 %vm148_vm2, %v780_v11 }
0x1188   :  { %v849_v13 = vpop.f32.mrb[6].mxu1 }
0x1189   :  { %v854_v14 = vrot.slane %v849_v13, 4  ;;  %v1259_v16 = vpop.f32.mrb[7].mxu1 }
0x118b   :  { %v856_v18 = vadd.f32 %v854_v14, %v1573_v15 }
0x118d   :  { %1399 = vtanh.f32 %v856_v18  ;;  %v1120_v20 = vmul.f32 -1.442695, %v856_v18 }
0x118f   :  { %1401 = vpow2.f32 %v1120_v20 }
0x1197   :  { %v1400_v19 = vpop.eup %1399 }
0x1198   :  { %869 = vrot.lane.b32.xlu0 %v1400_v19, %s1470_s30 }
0x1199   :  { %v1402_v21 = vpop.eup %1401 }
0x119a   :  { %v860_v22 = vadd.f32 1.0, %v1402_v21 }
0x119c   :  { %1403 = vrcp.f32 %v860_v22 }
0x11a6   :  { %v1404_v23 = vpop.eup %1403 }
0x11a7   :  { %v867_v27 = vmul.f32 %v1404_v23, %v865_v26 }
0x120a   :  { %v870_v24 = vpop.permute.xlu0 %869 }
0x120b   :  { %v872_v25 = vmul.f32 %v1404_v23, %v870_v24 }
0x120d   :  { %874 = vrot.lane.b32.xlu1 %v872_v25, %s1471_s3 }
0x127f   :  { %v875_v28 = vpop.permute.xlu1 %874 }
0x1280   :  { %v877_v29 = vadd.f32 %v875_v28, %v867_v27 }
0x1282   :  { %1405 = vtanh.f32 %v877_v29  ;;  %v972_v48 = vrot.slane %v877_v29, 6 }
0x128c   :  { %v1406_v30 = vpop.eup %1405 }
0x128d   :  { %880 = vrot.lane.b32.xlu0 %v1406_v30, %s1470_s30 }
0x12ff   :  { %v881_v31 = vpop.permute.xlu0 %880 }
0x1300   :  { %v883_v32 = vmul.f32 %v1404_v23, %v881_v31 }
0x1302   :  { %v885_v17 = vrot.slane %v883_v32, 4  ;;  %v998_v34 = vsel %vm993_vm4, %v997_v33, %v883_v32 }
0x1304   :  { %886 = vrot.lane.b32.xlu1 %v885_v17, %s1471_s3 }
0x1376   :  { %v887_v35 = vpop.permute.xlu1 %886 }
0x1377   :  { %1269 = vmatmul.mubr.msk.f32.vlgmr.msra.gmra.mrb[8].mxu0 %vm148_vm2, %v887_v35 }
0x144a   :  { %v956_v36 = vpop.f32.mrb[8].mxu0 }
0x144b   :  { %v961_v38 = vrot.slane %v956_v36, 2  ;;  %v1270_v39 = vpop.f32.mrb[9].mxu0 }
0x144d   :  { %v963_v40 = vadd.f32 %v961_v38, %v1573_v15 }
0x144f   :  { %1407 = vtanh.f32 %v963_v40  ;;  %v1122_v42 = vmul.f32 -1.442695, %v963_v40 }
0x1451   :  { %1409 = vpow2.f32 %v1122_v42 }
0x1459   :  { %v1408_v41 = vpop.eup %1407 }
0x145a   :  { %976 = vrot.lane.b32.xlu0 %v1408_v41, %s1470_s30 }
0x145b   :  { %v1410_v43 = vpop.eup %1409 }
0x145c   :  { %v967_v44 = vadd.f32 1.0, %v1410_v43 }
0x145e   :  { %1411 = vrcp.f32 %v967_v44 }
0x1468   :  { %v1412_v45 = vpop.eup %1411 }
0x1469   :  { %v974_v49 = vmul.f32 %v1412_v45, %v972_v48 }
0x14cc   :  { %v977_v46 = vpop.permute.xlu0 %976 }
0x14cd   :  { %v979_v47 = vmul.f32 %v1412_v45, %v977_v46 }
0x14cf   :  { %981 = vrot.lane.b32.xlu1 %v979_v47, %s1471_s3 }
0x14d3   :  { %1013 = vrot.lane.b32.xlu1 %v1624_v37, %s1471_s3  ;;  %v1334_v37 = vpack.c.bf16 %v1001_v53, %v1000_v52 }
0x14d5   :  { %1335 = vmatprep.subr.bf16.mxu1 %v1334_v37 }
0x14d6   :  { %1337 = vmatpush3.bf16.msra.mxu1 %v1334_v37 }
0x14d7   :  { %1339 = vmatprep.subr.bf16.mxu1 %v1338_v56 }
0x14da   :  { %1341 = vmatpush3.bf16.msra.mxu1 %v1338_v56 }
0x1541   :  { %v982_v15 = vpop.permute.xlu1 %981 }
0x1542   :  { %v984_v50 = vadd.f32 %v982_v15, %v974_v49 }
0x1544   :  { %1413 = vtanh.f32 %v984_v50 }
0x1545   :  { %v1014_v51 = vpop.permute.xlu1 %1013 }
0x1546   :  { %1279 = vmatprep.mubr.msk.f32.mxu1 %vm148_vm2, %v1014_v51 }
0x154e   :  { %v1414_v57 = vpop.eup %1413 }
0x154f   :  { %987 = vrot.lane.b32.xlu0 %v1414_v57, %s1470_s30 }
0x15c1   :  { %v988_v58 = vpop.permute.xlu0 %987 }
0x15c2   :  { %v990_v59 = vmul.f32 %v1412_v45, %v988_v58 }
0x15c4   :  { %v999_v60 = vsel %vm995_vm5, %v998_v34, %v990_v59 }
0x15c5   :  { %1015 = vrot.lane.b32.xlu0 %v999_v60, %s1471_s3 }
0x1637   :  { %v1016_v61 = vpop.permute.xlu0 %1015 }
0x1638   :  { %1280 = vmatmul.mubr.msk.f32.vlgmr.msra.gmra.mrb[8].mxu1 %vm148_vm2, %v1016_v61 }
0x170b   :  { %v1281_v63 = vpop.f32.mrb[8].mxu1 }
0x170c   :  { %v1093_v8 = vadd.f32 %v1281_v63, %v1123_v62  ;;  %v1087_v2 = vpop.f32.mrb[9].mxu1 }
0x170d   :  { %v1088_v1 = vadd.f32 %v1123_v62, %v1087_v2 }
0x170e   :  { %1098 = vst.msk [vmem:[%s1699_s6 + $0x8] sm:$0xff] %vm1096_vm6, %v1093_v8 }
0x170f   :  { %1097 = vst.msk [vmem:[%s1699_s6] sm:$0xff] %vm1096_vm6, %v1088_v1 }
0x1710   :  { %1103 = vsyncpa [#allocation3], 1 }
0x1711   :  { %1104 = vsyncpa [#allocation5], 1 }

</bundles_post_ra>
